<compile_context>
chip_gen: v7x
topology: tpu7x:2x2x1
jax: 0.10.0
libtpu: 0.0.40
codegen_flags: <defaults>
</compile_context>

<pallas_src>
import jax
import jax.numpy as jnp
import numpy as np
from jax.experimental import pallas as pl
from jax.experimental.pallas import tpu as pltpu


def _stable_sigmoid(x):
    # numerically stable logistic built from ops that always lower in Mosaic
    z = jnp.exp(-jnp.abs(x))
    return jnp.where(x >= 0, 1.0 / (1.0 + z), z / (1.0 + z))


def _pick_edge_tile(E):
    # largest 128-aligned edge tile (<= 512) that divides E; fall back to whole axis
    for t in (512, 256, 128):
        if E % t == 0:
            return t
    return E


# ----------------------------------------------------------------------------
# Kernel: grid over E-tiles (reduction axis).  Per step:
#   mask_sig tile -> lane-dense output
#   sxw_tile = src_tile @ (x @ w1)                       (x@w1 hoisted into scratch at k==0)
#   L = [dstT*ew_suff ; dstT*ew_nec_1 ; ... ]            (S*N, tE), all samples batched
#   acc += L @ sxw_tile                                  (S*N, H) f32 accumulator
# At the last step: bias + ReLU, block-mean readout via one small matmul, logits,
# stable softmax (approx reciprocal), pick label prob, pack [pr_suff, pr_nec].
# ----------------------------------------------------------------------------
def _explainer_kernel(mask_ref, noise_ref, src_ref, dstT_ref, x_ref,
                      w1_ref, b1_ref, w2_ref, b2_ref, rdo_ref, lab_ref,
                      pr_ref, mask_sig_ref, xw_sc, acc_sc):
    k = pl.program_id(0)
    n_1 = noise_ref.shape[0]

    @pl.when(k == 0)
    def _init():
        xw_sc[...] = jnp.dot(x_ref[...], w1_ref[...],
                             preferred_element_type=jnp.float32).astype(jnp.bfloat16)
        acc_sc[...] = jnp.zeros_like(acc_sc)

    # sigmoid of this tile of the edge-mask parameter, lane-dense (1, tE)
    mask_sig = _stable_sigmoid(mask_ref[...])
    mask_sig_ref[...] = mask_sig

    noise = noise_ref[...]                          # (n_1, tE) f32
    dstT = dstT_ref[...]                            # (N, tE)  bf16 one-hot (exact)
    one_minus = 1.0 - mask_sig                      # shared across necessity samples

    # edge-weight rows for all samples: [suff, nec_0, ..., nec_{n_1-1}]
    ew_rows = [mask_sig] + [one_minus + noise[i:i + 1, :] for i in range(n_1)]
    # stack per-sample weighted dstT along sublanes -> (S*N, tE), one wide MXU operand
    L = jnp.concatenate([dstT * w.astype(jnp.bfloat16) for w in ew_rows], axis=0)

    # source-gathered hidden pre-activations for this E tile: (tE, H)
    sxw = jnp.dot(src_ref[...], xw_sc[...],
                  preferred_element_type=jnp.float32).astype(jnp.bfloat16)

    acc_sc[...] += jnp.dot(L, sxw, preferred_element_type=jnp.float32)   # (S*N, H)

    @pl.when(k == pl.num_programs(0) - 1)
    def _finalize():
        h = jnp.maximum(acc_sc[...] + b1_ref[...], 0.0)                   # (S*N, H)
        # block-mean readout for all samples at once: (S, S*N) @ (S*N, H) -> (S, H)
        g = jnp.dot(rdo_ref[...], h, preferred_element_type=jnp.float32)
        logits = jnp.dot(g.astype(jnp.bfloat16), w2_ref[...],
                         preferred_element_type=jnp.float32) + b2_ref[...]  # (S, C)
        m = jnp.max(logits, axis=1, keepdims=True)
        ex = jnp.exp(logits - m)
        denom = jnp.sum(ex, axis=1, keepdims=True)
        probs = ex * pl.reciprocal(denom, approx=True)                    # (S, C)
        pr = jnp.sum(probs * lab_ref[...], axis=1, keepdims=True)         # (S, 1)
        pr_suff = pr[0:1, :]                                              # (1, 1)
        pr_nec = jnp.sum(pr[1:, :], axis=0, keepdims=True) * (1.0 / n_1)  # (1, 1)
        idx = jax.lax.broadcasted_iota(jnp.int32, (1, 2), 1)
        pr_ref[...] = jnp.where(idx == 0, pr_suff, pr_nec)                # (1, 2) packed


@jax.jit
def explainer_forward(mask_edge, noise_e, src_onehot, dstT_onehot, features,
                      w1, b1, w2, b2, readout, label_onehot):
    E = mask_edge.shape[1]
    n_1 = noise_e.shape[0]
    N, F = features.shape
    H = w1.shape[1]
    C = w2.shape[1]
    S = n_1 + 1
    tE = _pick_edge_tile(E)                 # edge-tile (reduction axis)
    grid = (E // tE,)

    # bf16 for the big MXU operands (one-hot is exact in bf16); f32 accumulation in-kernel.
    src_bf = src_onehot.astype(jnp.bfloat16)
    dstT_bf = dstT_onehot.astype(jnp.bfloat16)
    x_bf = features.astype(jnp.bfloat16)
    w1_bf = w1.astype(jnp.bfloat16)
    w2_bf = w2.astype(jnp.bfloat16)

    grid_spec = pltpu.PrefetchScalarGridSpec(
        num_scalar_prefetch=0,
        grid=grid,
        in_specs=[
            pl.BlockSpec((1, tE), lambda k: (0, k)),        # mask_edge (row, lane-dense)
            pl.BlockSpec((n_1, tE), lambda k: (0, k)),      # noise rows
            pl.BlockSpec((tE, N), lambda k: (k, 0)),        # src one-hot tile
            pl.BlockSpec((N, tE), lambda k: (0, k)),        # dstT one-hot tile
            pl.BlockSpec((N, F), lambda k: (0, 0)),         # features (resident)
            pl.BlockSpec((F, H), lambda k: (0, 0)),         # w1
            pl.BlockSpec((1, H), lambda k: (0, 0)),         # b1
            pl.BlockSpec((H, C), lambda k: (0, 0)),         # w2
            pl.BlockSpec((1, C), lambda k: (0, 0)),         # b2
            pl.BlockSpec((S, S * N), lambda k: (0, 0)),     # block-mean readout matrix
            pl.BlockSpec((1, C), lambda k: (0, 0)),         # label one-hot
        ],
        out_specs=[
            pl.BlockSpec((1, 2), lambda k: (0, 0)),         # packed [pr_suff, pr_nec]
            pl.BlockSpec((1, tE), lambda k: (0, k)),        # mask_edge_sigmoid (lane-dense)
        ],
        scratch_shapes=[
            pltpu.VMEM((N, H), jnp.bfloat16),               # hoisted x @ w1
            pltpu.VMEM((S * N, H), jnp.float32),            # propagation accumulator
        ],
    )

    pr, mask_sig = pl.pallas_call(
        _explainer_kernel,
        out_shape=(
            jax.ShapeDtypeStruct((1, 2), jnp.float32),
            jax.ShapeDtypeStruct((1, E), jnp.float32),
        ),
        grid_spec=grid_spec,
        compiler_params=pltpu.CompilerParams(
            dimension_semantics=("arbitrary",),             # edge axis is a reduction
        ),
    )(mask_edge, noise_e, src_bf, dstT_bf, x_bf, w1_bf, b1, w2_bf, b2,
      readout, label_onehot)

    return pr[0, 0], pr[0, 1], mask_sig[0]


# ---------------- plain-JAX references (label from __init__ + correctness check) --------
def _gnn_probs_f32(ew_row, src_onehot, dstT_onehot, x, w1, b1, w2, b2):
    # full-precision surrogate GCN used for original_prediction() (eweight=None -> ones)
    sxw = src_onehot @ (x @ w1)
    h = jnp.maximum((dstT_onehot * ew_row) @ sxw + b1, 0.0)
    g = jnp.mean(h, axis=0, keepdims=True)
    return jax.nn.softmax(g @ w2 + b2, axis=1)


def _forward_ref(mask_edge, noise_e, src_onehot, dstT_onehot, x, w1, b1, w2, b2, lab):
    # mirrors the kernel's bf16 matmul operands / f32 accumulation
    bf = jnp.bfloat16
    n_1 = noise_e.shape[0]
    mask_sig = jax.nn.sigmoid(mask_edge)
    xw = jnp.dot(x.astype(bf), w1.astype(bf),
                 preferred_element_type=jnp.float32).astype(bf)
    sxw = jnp.dot(src_onehot.astype(bf), xw,
                  preferred_element_type=jnp.float32).astype(bf)
    dstT_bf = dstT_onehot.astype(bf)

    def prob_at_label(ew_row):
        L = dstT_bf * ew_row.astype(bf)
        h = jnp.maximum(jnp.dot(L, sxw, preferred_element_type=jnp.float32) + b1, 0.0)
        g = jnp.mean(h, axis=0, keepdims=True)
        logits = jnp.dot(g.astype(bf), w2.astype(bf),
                         preferred_element_type=jnp.float32) + b2
        return jnp.sum(jax.nn.softmax(logits, axis=1) * lab)

    pr_suff = prob_at_label(mask_sig)
    pr_nec = sum(prob_at_label(1.0 - mask_sig + noise_e[i:i + 1, :])
                 for i in range(n_1)) / n_1
    return pr_suff, pr_nec, mask_sig


if __name__ == "__main__":
    key = jax.random.PRNGKey(0)
    (k_src, k_dst, k_feat, k_w1, k_b1, k_w2, k_b2, k_mask, k_noise) = jax.random.split(key, 9)

    # small deterministic sizes (edge dim gives a 2-step reduction grid with 512-wide tiles)
    N = 16      # num_nodes
    E = 1024    # num_edges
    F = 32      # feature dim
    H = 64      # hidden dim
    C = 8       # num classes
    n_1 = 2
    epsilon = 0.025
    S = n_1 + 1

    # random directed edge list -> one-hot incidence matrices
    src_idx = jax.random.randint(k_src, (E,), 0, N)
    dst_idx = jax.random.randint(k_dst, (E,), 0, N)
    src_onehot = jax.nn.one_hot(src_idx, N, dtype=jnp.float32)        # (E, N)
    dstT_onehot = jax.nn.one_hot(dst_idx, N, dtype=jnp.float32).T     # (N, E)

    features_ori = jax.random.normal(k_feat, (N, F), dtype=jnp.float32)

    # deterministic surrogate-GNN parameters
    w1 = jax.random.normal(k_w1, (F, H), dtype=jnp.float32) / jnp.sqrt(F)
    b1 = jax.random.normal(k_b1, (1, H), dtype=jnp.float32) * 0.01
    w2 = jax.random.normal(k_w2, (H, C), dtype=jnp.float32) / jnp.sqrt(H)
    b2 = jax.random.normal(k_b2, (1, C), dtype=jnp.float32) * 0.01

    # reset_parameter('uniform'): mask_edge ~ U(-1/sqrt(E), 1/sqrt(E)), kept lane-dense (1, E)
    stdv_edge = 1.0 / (E ** 0.5)
    mask_edge = jax.random.uniform(k_mask, (1, E), minval=-stdv_edge, maxval=stdv_edge,
                                   dtype=jnp.float32)

    # per-sample 'pn' noise: (rand - 0.5) * 2 * epsilon, one row per sample
    noise_e = (jax.random.uniform(k_noise, (n_1, E), dtype=jnp.float32) - 0.5) * 2.0 * epsilon

    # original_prediction(): label = argmax softmax(model(graph, features_ori))
    pred_ori = _gnn_probs_f32(jnp.ones((1, E), jnp.float32), src_onehot, dstT_onehot,
                              features_ori, w1, b1, w2, b2)
    label = int(jnp.argmax(pred_ori[0]))
    label_onehot = jax.nn.one_hot(jnp.array([label]), C, dtype=jnp.float32)   # (1, C)

    # block-mean readout matrix: R[s, s*N + n] = 1/N  -> mean over nodes per sample
    readout = jnp.kron(jnp.eye(S, dtype=jnp.float32),
                       jnp.full((1, N), 1.0 / N, dtype=jnp.float32))          # (S, S*N)

    pr_suff, pr_nec, mask_edge_sigmoid = explainer_forward(
        mask_edge, noise_e, src_onehot, dstT_onehot, features_ori,
        w1, b1, w2, b2, readout, label_onehot)
    jax.block_until_ready((pr_suff, pr_nec, mask_edge_sigmoid))

    # correctness check against a bf16-mirrored pure-JAX reference
    ref_suff, ref_nec, ref_mask = _forward_ref(
        mask_edge, noise_e, src_onehot, dstT_onehot, features_ori,
        w1, b1, w2, b2, label_onehot)
    np.testing.assert_allclose(np.asarray(pr_suff), np.asarray(ref_suff), rtol=5e-3, atol=5e-3)
    np.testing.assert_allclose(np.asarray(pr_nec), np.asarray(ref_nec), rtol=5e-3, atol=5e-3)
    np.testing.assert_allclose(np.asarray(mask_edge_sigmoid), np.asarray(ref_mask[0]),
                               rtol=1e-5, atol=1e-5)

    print("KERNEL_OK")
</pallas_src>

<mosaic_0001>
module attributes {stable_mosaic.version = 11 : i64} {
  func.func @_explainer_kernel(%arg0: i32, %arg1: memref<1x512xf32, #tpu.memory_space<vmem>>, %arg2: memref<2x512xf32, #tpu.memory_space<vmem>>, %arg3: memref<512x16xbf16, #tpu.memory_space<vmem>>, %arg4: memref<16x512xbf16, #tpu.memory_space<vmem>>, %arg5: memref<16x32xbf16, #tpu.memory_space<vmem>>, %arg6: memref<32x64xbf16, #tpu.memory_space<vmem>>, %arg7: memref<1x64xf32, #tpu.memory_space<vmem>>, %arg8: memref<64x8xbf16, #tpu.memory_space<vmem>>, %arg9: memref<1x8xf32, #tpu.memory_space<vmem>>, %arg10: memref<3x48xf32, #tpu.memory_space<vmem>>, %arg11: memref<1x8xf32, #tpu.memory_space<vmem>>, %arg12: memref<1x2xf32, #tpu.memory_space<vmem>>, %arg13: memref<1x512xf32, #tpu.memory_space<vmem>>, %arg14: memref<16x64xbf16, #tpu.memory_space<vmem>>, %arg15: memref<48x64xf32, #tpu.memory_space<vmem>>) attributes {dimension_semantics = [#tpu.dimension_semantics<arbitrary>], iteration_bounds = array<i64: 2>, scalar_prefetch = 0 : i64, scratch_operands = 2 : i64, tpu.core_type = #tpu.core_type<tc>, window_params = [{transform_indices = @transform_0, window_bounds = array<i64: 1, 512>}, {transform_indices = @transform_1, window_bounds = array<i64: 2, 512>}, {transform_indices = @transform_2, window_bounds = array<i64: 512, 16>}, {transform_indices = @transform_3, window_bounds = array<i64: 16, 512>}, {pipeline_mode = #tpu.pipeline_mode<synchronous>, transform_indices = @transform_4, window_bounds = array<i64: 16, 32>}, {pipeline_mode = #tpu.pipeline_mode<synchronous>, transform_indices = @transform_5, window_bounds = array<i64: 32, 64>}, {pipeline_mode = #tpu.pipeline_mode<synchronous>, transform_indices = @transform_6, window_bounds = array<i64: 1, 64>}, {pipeline_mode = #tpu.pipeline_mode<synchronous>, transform_indices = @transform_7, window_bounds = array<i64: 64, 8>}, {pipeline_mode = #tpu.pipeline_mode<synchronous>, transform_indices = @transform_8, window_bounds = array<i64: 1, 8>}, {pipeline_mode = #tpu.pipeline_mode<synchronous>, transform_indices = @transform_9, window_bounds = array<i64: 3, 48>}, {pipeline_mode = #tpu.pipeline_mode<synchronous>, transform_indices = @transform_10, window_bounds = array<i64: 1, 8>}, {pipeline_mode = #tpu.pipeline_mode<synchronous>, transform_indices = @transform_11, window_bounds = array<i64: 1, 2>}, {transform_indices = @transform_12, window_bounds = array<i64: 1, 512>}]} {
    %c0_i32 = arith.constant 0 : i32
    %0 = arith.cmpi eq, %arg0, %c0_i32 : i32
    %1 = arith.extui %0 : i1 to i32
    %c0_i32_0 = arith.constant 0 : i32
    %2 = arith.cmpi ne, %1, %c0_i32_0 : i32
    scf.if %2 {
      %c0_24 = arith.constant 0 : index
      %c0_25 = arith.constant 0 : index
      %48 = vector.load %arg5[%c0_24, %c0_25] : memref<16x32xbf16, #tpu.memory_space<vmem>>, vector<16x32xbf16>
      %c0_26 = arith.constant 0 : index
      %c0_27 = arith.constant 0 : index
      %49 = vector.load %arg6[%c0_26, %c0_27] : memref<32x64xbf16, #tpu.memory_space<vmem>>, vector<32x64xbf16>
      %cst_28 = arith.constant dense<0.000000e+00> : vector<16x64xf32>
      %50 = tpu.matmul %48, %49, %cst_28 {dimension_numbers = #tpu.dot_dimension_numbers<[1], [0], [0], [1], [0, 0, 1, 1], [], []>} : vector<16x32xbf16>, vector<32x64xbf16>, vector<16x64xf32> -> vector<16x64xf32>
      %51 = arith.truncf %50 : vector<16x64xf32> to vector<16x64xbf16>
      %c0_29 = arith.constant 0 : index
      %c0_30 = arith.constant 0 : index
      %52 = vector.load %arg14[%c0_29, %c0_30] : memref<16x64xbf16, #tpu.memory_space<vmem>>, vector<16x64xbf16>
      tpu.vector_store %arg14[%c0_29, %c0_30], %51 {strides = array<i32>} : memref<16x64xbf16, #tpu.memory_space<vmem>>, vector<16x64xbf16>,
      %cst_31 = arith.constant 0.000000e+00 : f32
      %53 = vector.broadcast %cst_31 : f32 to vector<48x64xf32>
      %c0_32 = arith.constant 0 : index
      %c0_33 = arith.constant 0 : index
      %54 = vector.load %arg15[%c0_32, %c0_33] : memref<48x64xf32, #tpu.memory_space<vmem>>, vector<48x64xf32>
      tpu.vector_store %arg15[%c0_32, %c0_33], %53 {strides = array<i32>} : memref<48x64xf32, #tpu.memory_space<vmem>>, vector<48x64xf32>,
    } else {
    }
    %c0 = arith.constant 0 : index
    %c0_1 = arith.constant 0 : index
    %3 = vector.load %arg1[%c0, %c0_1] : memref<1x512xf32, #tpu.memory_space<vmem>>, vector<1x512xf32>
    %4 = math.absf %3 : vector<1x512xf32>
    %cst = arith.constant 0.000000e+00 : f32
    %5 = vector.broadcast %cst : f32 to vector<1x512xf32>
    %6 = arith.subf %5, %4 : vector<1x512xf32>
    %7 = math.exp %6 : vector<1x512xf32>
    %cst_2 = arith.constant 0.000000e+00 : f32
    %8 = vector.broadcast %cst_2 : f32 to vector<1x512xf32>
    %9 = arith.cmpf oge, %3, %8 : vector<1x512xf32>
    %cst_3 = arith.constant 1.000000e+00 : f32
    %10 = vector.broadcast %cst_3 : f32 to vector<1x512xf32>
    %11 = arith.addf %10, %7 : vector<1x512xf32>
    %cst_4 = arith.constant 1.000000e+00 : f32
    %12 = vector.broadcast %cst_4 : f32 to vector<1x512xf32>
    %13 = arith.divf %12, %11 : vector<1x512xf32>
    %cst_5 = arith.constant 1.000000e+00 : f32
    %14 = vector.broadcast %cst_5 : f32 to vector<1x512xf32>
    %15 = arith.addf %14, %7 : vector<1x512xf32>
    %16 = arith.divf %7, %15 : vector<1x512xf32>
    %17 = arith.select %9, %13, %16 : vector<1x512xi1>, vector<1x512xf32>
    %c0_6 = arith.constant 0 : index
    %c0_7 = arith.constant 0 : index
    %18 = vector.load %arg13[%c0_6, %c0_7] : memref<1x512xf32, #tpu.memory_space<vmem>>, vector<1x512xf32>
    tpu.vector_store %arg13[%c0_6, %c0_7], %17 {strides = array<i32>} : memref<1x512xf32, #tpu.memory_space<vmem>>, vector<1x512xf32>,
    %c0_8 = arith.constant 0 : index
    %c0_9 = arith.constant 0 : index
    %19 = vector.load %arg2[%c0_8, %c0_9] : memref<2x512xf32, #tpu.memory_space<vmem>>, vector<2x512xf32>
    %c0_10 = arith.constant 0 : index
    %c0_11 = arith.constant 0 : index
    %20 = vector.load %arg4[%c0_10, %c0_11] : memref<16x512xbf16, #tpu.memory_space<vmem>>, vector<16x512xbf16>
    %cst_12 = arith.constant 1.000000e+00 : f32
    %21 = vector.broadcast %cst_12 : f32 to vector<1x512xf32>
    %22 = arith.subf %21, %17 : vector<1x512xf32>
    %23 = vector.extract_strided_slice %19 {offsets = [0, 0], sizes = [1, 512], strides = [1, 1]} : vector<2x512xf32> to vector<1x512xf32>
    %24 = arith.addf %22, %23 : vector<1x512xf32>
    %25 = vector.extract_strided_slice %19 {offsets = [1, 0], sizes = [1, 512], strides = [1, 1]} : vector<2x512xf32> to vector<1x512xf32>
    %26 = arith.addf %22, %25 : vector<1x512xf32>
    %27 = arith.truncf %17 : vector<1x512xf32> to vector<1x512xbf16>
    %28 = vector.broadcast %27 : vector<1x512xbf16> to vector<16x512xbf16>
    %29 = arith.mulf %20, %28 : vector<16x512xbf16>
    %30 = arith.truncf %24 : vector<1x512xf32> to vector<1x512xbf16>
    %31 = vector.broadcast %30 : vector<1x512xbf16> to vector<16x512xbf16>
    %32 = arith.mulf %20, %31 : vector<16x512xbf16>
    %33 = arith.truncf %26 : vector<1x512xf32> to vector<1x512xbf16>
    %34 = vector.broadcast %33 : vector<1x512xbf16> to vector<16x512xbf16>
    %35 = arith.mulf %20, %34 : vector<16x512xbf16>
    %36 = tpu.concatenate %29, %32, %35 in 0 : vector<16x512xbf16>, vector<16x512xbf16>, vector<16x512xbf16> -> vector<48x512xbf16>
    %c0_13 = arith.constant 0 : index
    %c0_14 = arith.constant 0 : index
    %37 = vector.load %arg3[%c0_13, %c0_14] : memref<512x16xbf16, #tpu.memory_space<vmem>>, vector<512x16xbf16>
    %c0_15 = arith.constant 0 : index
    %c0_16 = arith.constant 0 : index
    %38 = vector.load %arg14[%c0_15, %c0_16] : memref<16x64xbf16, #tpu.memory_space<vmem>>, vector<16x64xbf16>
    %cst_17 = arith.constant dense<0.000000e+00> : vector<512x64xf32>
    %39 = tpu.matmul %37, %38, %cst_17 {dimension_numbers = #tpu.dot_dimension_numbers<[1], [0], [0], [1], [0, 0, 1, 1], [], []>} : vector<512x16xbf16>, vector<16x64xbf16>, vector<512x64xf32> -> vector<512x64xf32>
    %40 = arith.truncf %39 : vector<512x64xf32> to vector<512x64xbf16>
    %c0_18 = arith.constant 0 : index
    %c0_19 = arith.constant 0 : index
    %41 = vector.load %arg15[%c0_18, %c0_19] : memref<48x64xf32, #tpu.memory_space<vmem>>, vector<48x64xf32>
    %cst_20 = arith.constant dense<0.000000e+00> : vector<48x64xf32>
    %42 = tpu.matmul %36, %40, %cst_20 {dimension_numbers = #tpu.dot_dimension_numbers<[1], [0], [0], [1], [0, 0, 1, 1], [], []>} : vector<48x512xbf16>, vector<512x64xbf16>, vector<48x64xf32> -> vector<48x64xf32>
    %43 = arith.addf %41, %42 : vector<48x64xf32>
    %c0_21 = arith.constant 0 : index
    %c0_22 = arith.constant 0 : index
    %44 = vector.load %arg15[%c0_21, %c0_22] : memref<48x64xf32, #tpu.memory_space<vmem>>, vector<48x64xf32>
    tpu.vector_store %arg15[%c0_21, %c0_22], %43 {strides = array<i32>} : memref<48x64xf32, #tpu.memory_space<vmem>>, vector<48x64xf32>,
    %c1_i32 = arith.constant 1 : i32
    %45 = arith.cmpi eq, %arg0, %c1_i32 : i32
    %46 = arith.extui %45 : i1 to i32
    %c0_i32_23 = arith.constant 0 : i32
    %47 = arith.cmpi ne, %46, %c0_i32_23 : i32
    scf.if %47 {
      %c0_24 = arith.constant 0 : index
      %c0_25 = arith.constant 0 : index
      %48 = vector.load %arg15[%c0_24, %c0_25] : memref<48x64xf32, #tpu.memory_space<vmem>>, vector<48x64xf32>
      %c0_26 = arith.constant 0 : index
      %c0_27 = arith.constant 0 : index
      %49 = vector.load %arg7[%c0_26, %c0_27] : memref<1x64xf32, #tpu.memory_space<vmem>>, vector<1x64xf32>
      %50 = vector.broadcast %49 : vector<1x64xf32> to vector<48x64xf32>
      %51 = arith.addf %48, %50 : vector<48x64xf32>
      %cst_28 = arith.constant 0.000000e+00 : f32
      %52 = vector.broadcast %cst_28 : f32 to vector<48x64xf32>
      %53 = arith.maximumf %51, %52 : vector<48x64xf32>
      %c0_29 = arith.constant 0 : index
      %c0_30 = arith.constant 0 : index
      %54 = vector.load %arg10[%c0_29, %c0_30] : memref<3x48xf32, #tpu.memory_space<vmem>>, vector<3x48xf32>
      %cst_31 = arith.constant dense<0.000000e+00> : vector<3x64xf32>
      %55 = tpu.matmul %54, %53, %cst_31 {dimension_numbers = #tpu.dot_dimension_numbers<[1], [0], [0], [1], [0, 0, 1, 1], [], []>} : vector<3x48xf32>, vector<48x64xf32>, vector<3x64xf32> -> vector<3x64xf32>
      %56 = arith.truncf %55 : vector<3x64xf32> to vector<3x64xbf16>
      %c0_32 = arith.constant 0 : index
      %c0_33 = arith.constant 0 : index
      %57 = vector.load %arg8[%c0_32, %c0_33] : memref<64x8xbf16, #tpu.memory_space<vmem>>, vector<64x8xbf16>
      %cst_34 = arith.constant dense<0.000000e+00> : vector<3x8xf32>
      %58 = tpu.matmul %56, %57, %cst_34 {dimension_numbers = #tpu.dot_dimension_numbers<[1], [0], [0], [1], [0, 0, 1, 1], [], []>} : vector<3x64xbf16>, vector<64x8xbf16>, vector<3x8xf32> -> vector<3x8xf32>
      %c0_35 = arith.constant 0 : index
      %c0_36 = arith.constant 0 : index
      %59 = vector.load %arg9[%c0_35, %c0_36] : memref<1x8xf32, #tpu.memory_space<vmem>>, vector<1x8xf32>
      %60 = vector.broadcast %59 : vector<1x8xf32> to vector<3x8xf32>
      %61 = arith.addf %58, %60 : vector<3x8xf32>
      %cst_37 = arith.constant dense<0xFF800000> : vector<3xf32>
      %62 = vector.multi_reduction <maximumf>, %61, %cst_37 [1] : vector<3x8xf32> to vector<3xf32>
      %63 = vector.shape_cast %62 : vector<3xf32> to vector<3x1xf32>
      %64 = vector.broadcast %63 : vector<3x1xf32> to vector<3x8xf32>
      %65 = arith.subf %61, %64 : vector<3x8xf32>
      %66 = math.exp %65 : vector<3x8xf32>
      %cst_38 = arith.constant dense<0.000000e+00> : vector<3xf32>
      %67 = vector.multi_reduction <add>, %66, %cst_38 [1] : vector<3x8xf32> to vector<3xf32>
      %68 = vector.shape_cast %67 : vector<3xf32> to vector<3x1xf32>
      %69 = tpu.reciprocal %68 {approx = true} : vector<3x1xf32> -> vector<3x1xf32>
      %70 = vector.broadcast %69 : vector<3x1xf32> to vector<3x8xf32>
      %71 = arith.mulf %66, %70 : vector<3x8xf32>
      %c0_39 = arith.constant 0 : index
      %c0_40 = arith.constant 0 : index
      %72 = vector.load %arg11[%c0_39, %c0_40] : memref<1x8xf32, #tpu.memory_space<vmem>>, vector<1x8xf32>
      %73 = vector.broadcast %72 : vector<1x8xf32> to vector<3x8xf32>
      %74 = arith.mulf %71, %73 : vector<3x8xf32>
      %cst_41 = arith.constant dense<0.000000e+00> : vector<3xf32>
      %75 = vector.multi_reduction <add>, %74, %cst_41 [1] : vector<3x8xf32> to vector<3xf32>
      %76 = vector.shape_cast %75 : vector<3xf32> to vector<3x1xf32>
      %77 = vector.extract_strided_slice %76 {offsets = [0, 0], sizes = [1, 1], strides = [1, 1]} : vector<3x1xf32> to vector<1x1xf32>
      %78 = vector.extract_strided_slice %76 {offsets = [1, 0], sizes = [2, 1], strides = [1, 1]} : vector<3x1xf32> to vector<2x1xf32>
      %cst_42 = arith.constant dense<0.000000e+00> : vector<1xf32>
      %79 = vector.multi_reduction <add>, %78, %cst_42 [0] : vector<2x1xf32> to vector<1xf32>
      %80 = vector.shape_cast %79 : vector<1xf32> to vector<1x1xf32>
      %cst_43 = arith.constant 5.000000e-01 : f32
      %81 = vector.broadcast %cst_43 : f32 to vector<1x1xf32>
      %82 = arith.mulf %80, %81 : vector<1x1xf32>
      %83 = tpu.iota {dimensions = array<i32: 1>} : vector<1x2xi32>
      %c0_i32_44 = arith.constant 0 : i32
      %84 = vector.broadcast %c0_i32_44 : i32 to vector<1x2xi32>
      %85 = arith.cmpi eq, %83, %84 : vector<1x2xi32>
      %86 = vector.shape_cast %77 : vector<1x1xf32> to vector<1x1xf32>
      %87 = vector.broadcast %86 : vector<1x1xf32> to vector<1x2xf32>
      %88 = vector.shape_cast %82 : vector<1x1xf32> to vector<1x1xf32>
      %89 = vector.broadcast %88 : vector<1x1xf32> to vector<1x2xf32>
      %90 = arith.select %85, %87, %89 : vector<1x2xi1>, vector<1x2xf32>
      %c0_45 = arith.constant 0 : index
      %c0_46 = arith.constant 0 : index
      %91 = vector.load %arg12[%c0_45, %c0_46] : memref<1x2xf32, #tpu.memory_space<vmem>>, vector<1x2xf32>
      tpu.vector_store %arg12[%c0_45, %c0_46], %90 {strides = array<i32>} : memref<1x2xf32, #tpu.memory_space<vmem>>, vector<1x2xf32>,
    } else {
    }
    return
  }
  func.func @transform_0(%arg0: i32) -> (i32, i32) {
    %c0_i32 = arith.constant 0 : i32
    %c0_i32_0 = arith.constant 0 : i32
    return %c0_i32, %arg0 : i32, i32
  }
  func.func @transform_1(%arg0: i32) -> (i32, i32) {
    %c0_i32 = arith.constant 0 : i32
    %c0_i32_0 = arith.constant 0 : i32
    return %c0_i32, %arg0 : i32, i32
  }
  func.func @transform_2(%arg0: i32) -> (i32, i32) {
    %c0_i32 = arith.constant 0 : i32
    %c0_i32_0 = arith.constant 0 : i32
    return %arg0, %c0_i32 : i32, i32
  }
  func.func @transform_3(%arg0: i32) -> (i32, i32) {
    %c0_i32 = arith.constant 0 : i32
    %c0_i32_0 = arith.constant 0 : i32
    return %c0_i32, %arg0 : i32, i32
  }
  func.func @transform_4(%arg0: i32) -> (i32, i32) {
    %c0_i32 = arith.constant 0 : i32
    %c0_i32_0 = arith.constant 0 : i32
    %c0_i32_1 = arith.constant 0 : i32
    return %c0_i32, %c0_i32_0 : i32, i32
  }
  func.func @transform_5(%arg0: i32) -> (i32, i32) {
    %c0_i32 = arith.constant 0 : i32
    %c0_i32_0 = arith.constant 0 : i32
    %c0_i32_1 = arith.constant 0 : i32
    return %c0_i32, %c0_i32_0 : i32, i32
  }
  func.func @transform_6(%arg0: i32) -> (i32, i32) {
    %c0_i32 = arith.constant 0 : i32
    %c0_i32_0 = arith.constant 0 : i32
    %c0_i32_1 = arith.constant 0 : i32
    return %c0_i32, %c0_i32_0 : i32, i32
  }
  func.func @transform_7(%arg0: i32) -> (i32, i32) {
    %c0_i32 = arith.constant 0 : i32
    %c0_i32_0 = arith.constant 0 : i32
    %c0_i32_1 = arith.constant 0 : i32
    return %c0_i32, %c0_i32_0 : i32, i32
  }
  func.func @transform_8(%arg0: i32) -> (i32, i32) {
    %c0_i32 = arith.constant 0 : i32
    %c0_i32_0 = arith.constant 0 : i32
    %c0_i32_1 = arith.constant 0 : i32
    return %c0_i32, %c0_i32_0 : i32, i32
  }
  func.func @transform_9(%arg0: i32) -> (i32, i32) {
    %c0_i32 = arith.constant 0 : i32
    %c0_i32_0 = arith.constant 0 : i32
    %c0_i32_1 = arith.constant 0 : i32
    return %c0_i32, %c0_i32_0 : i32, i32
  }
  func.func @transform_10(%arg0: i32) -> (i32, i32) {
    %c0_i32 = arith.constant 0 : i32
    %c0_i32_0 = arith.constant 0 : i32
    %c0_i32_1 = arith.constant 0 : i32
    return %c0_i32, %c0_i32_0 : i32, i32
  }
  func.func @transform_11(%arg0: i32) -> (i32, i32) {
    %c0_i32 = arith.constant 0 : i32
    %c0_i32_0 = arith.constant 0 : i32
    %c0_i32_1 = arith.constant 0 : i32
    return %c0_i32, %c0_i32_0 : i32, i32
  }
  func.func @transform_12(%arg0: i32) -> (i32, i32) {
    %c0_i32 = arith.constant 0 : i32
    %c0_i32_0 = arith.constant 0 : i32
    return %c0_i32, %arg0 : i32, i32
  }
}

</mosaic_0001>

<bundles_post_ra>
// kernel: explainer_forward.1
= control target key start
LH: loop header
LB: loop body
LE: loop exit
PB: predicated region body
PF: predicated region fallthrough
CT: control target
= control target key end

     0   :  { %s2997_s0 = inlined_call_operand.vmem [shape: f32[1,1024], index: 0, kind: input, shape index: {}]   ;;  %s2998_s1 = inlined_call_operand.vmem [shape: f32[2,1024], index: 1, kind: input, shape index: {}]   ;;  %s2999_s2 = inlined_call_operand.vmem [shape: bf16[1024,16], index: 2, kind: input, shape index: {}]   ;;  %s3000_s3 = inlined_call_operand.vmem [shape: bf16[16,1024], index: 3, kind: input, shape index: {}]   ;;  %s3001_s4 = inlined_call_operand.vmem [shape: bf16[16,32], index: 4, kind: input, shape index: {}]   ;;  %s3002_s5 = inlined_call_operand.vmem [shape: bf16[32,64], index: 5, kind: input, shape index: {}]   ;;  %s3003_s6 = inlined_call_operand.vmem [shape: f32[1,64], index: 6, kind: input, shape index: {}]   ;;  %s3004_s7 = inlined_call_operand.vmem [shape: bf16[64,8], index: 7, kind: input, shape index: {}]   ;;  %s3005_s8 = inlined_call_operand.vmem [shape: f32[1,8], index: 8, kind: input, shape index: {}]   ;;  %s3006_s9 = inlined_call_operand.vmem [shape: f32[3,48], index: 9, kind: input, shape index: {}]   ;;  %s3007_s10 = inlined_call_operand.vmem [shape: f32[1,8], index: 10, kind: input, shape index: {}]   ;;  %s3008_s11 = inlined_call_operand.vmem [shape: f32[1,2], index: 11, kind: output, shape index: {0}]   ;;  %s3009_s12 = inlined_call_operand.hbm [shape: f32[1,1024], index: 12, kind: output, shape index: {1}]  }
   0x1   :  { %3020 = sst [smem:[#allocation17_spill]] %s3000_s3 }
   0x2   :  { %18 = vsyncpa [#allocation6], 0 }
   0x3   :  { %20 = vsyncpa [#allocation6 + $0x1], 0  ;;  %s2581_s21 = smov 0   ;;  %s2583_s22 = smov 0  }
   0x4   :  { %s2585_s23 = smov 0   ;;  %s2587_s24 = smov 0  }
   0x5 LB: > { %3021 = sst [smem:[#allocation8_spill]] %s2496_s21  ;;  %s2602_s25 = sadd.s32 4294967295, %s2508_s24   ;;  %s2508_s24 = sphi %s2587_s24, %s3038_s24   ;;  %s2504_s23 = sphi %s2585_s23, %s3041_s23   ;;  %s2500_s22 = sphi %s2583_s22, %s3040_s22   ;;  %s2496_s21 = sphi %s2581_s21, %s3039_s21  }
   0x6   : > { %3022 = sst [smem:[#allocation9_spill]] %s2500_s22  ;;  %s2008_s26 = sadd.s32 4294967294, %s2508_s24  }
   0x7   : > { %3023 = sst [smem:[#allocation10_spill]] %s2504_s23  ;;  %s2606_s27 = sadd.s32 1, %s2508_s24  }
   0x8   : > { %3024 = sst [smem:[#allocation11_spill]] %s2508_s24  ;;  %s111_s28 = sadd.s32 1, %s2504_s23 }
   0x9   : > { %3025 = sst [smem:[#allocation12_spill]] %s2606_s27  ;;  %s108_s29 = ssub.s32 %s2508_s24, %s2606_s27 }
   0xa   : > { %p118_p0 = scmp.ne.s32.totalorder %s2504_s23, %s2500_s22  ;;  %p109_p1 = scmp.eq.s32.totalorder %s108_s29, 0 }
   0xb   : > { %p119_p2 = scmp.eq.s32.totalorder %s2508_s24, 0  ;;  %p316_p3 = scmp.eq.s32.totalorder %s2602_s25, 1 }
   0xc   : > { %p321_p4 = scmp.ne.s32.totalorder %s2500_s22, %s2496_s21  ;;  %p322_p7 = scmp.eq.s32.totalorder %s2008_s26, 1 }
   0xd   : > { %s2618_s30 = scalar_select %p109_p1, %s2504_s23, %s111_s28  }
   0xe   : > { %p120_p5 = por %p119_p2, %p118_p0  ;;  %p2620_p6 = por %p316_p3, %p118_p0 }
   0xf   : > { %3026 = sst [smem:[#allocation13_spill]] %s2618_s30  ;;  %p2624_p8 = por %p322_p7, %p321_p4 }
  0x10   : > { %s3027_s13 = scalar_select %p2620_p6, 1, 0 }
  0x11   : > { %s3029_s14 = scalar_select %p2624_p8, 1, 0 }
  0x12   : > { %3028 = sst [smem:[#allocation14_spill]] %s3027_s13  ;;  %p2010_p9 = scmp.ge.s32.totalorder %s2508_s24, 2 }
  0x13   : > { %3030 = sst [smem:[#allocation15_spill]] %s3029_s14 }
  0x14   : > { %359 = sbr.rel (%p2010_p9) target bundleno = 39 (0x27), region = 44 }
  0x1b   : > { %388 = sbr.rel (!%p120_p5) target bundleno = 39 (0x27), region = 60  ;;  %s390_s15 = sand.u32 (%p120_p5), 1, %s2504_s23  }
  0x1c   : > { %s2125_s16 = sshll.u32 (%p120_p5), %s2508_s24, 4  ;;  %s2011_s17 = sshll.u32 (%p120_p5), %s390_s15, 5 }
  0x1d   : > { %s3031_s3 = sld [smem:[#allocation17_spill]] (%p120_p5)  ;;  %s392_s26 = scalar_lea.vmem (%p120_p5), [#allocation4], %s2011_s17 }
  0x23   : > { %s395_s20 = scalar_lea.vmem %s3031_s3, %s2125_s16 }
  0x24   : > { %v408_v0 = vld [vmem:[%s395_s20] sm:$0xff]  ;;  %v410_v1 = vld [vmem:[%s395_s20 + $0x8] sm:$0xff] }
  0x25   : > { %v412_v2 = vld [vmem:[%s395_s20 + $0x20] sm:$0xff]  ;;  %409 = vst [vmem:[%s392_s26] sm:$0xff] %v408_v0  ;;  %411 = vst [vmem:[%s392_s26 + $0x8] sm:$0xff] %v410_v1  ;;  %v414_v3 = vld [vmem:[%s395_s20 + $0x28] sm:$0xff] }
  0x26   : > { %413 = vst [vmem:[%s392_s26 + $0x10] sm:$0xff] %v412_v2  ;;  %415 = vst [vmem:[%s392_s26 + $0x18] sm:$0xff] %v414_v3 }
  0x27 PF: > { %p2014_p10 = scmp.ge.s32.totalorder %s2508_s24, 1  ;;  %p420_p11 = scmp.lt.s32.totalorder %s2508_s24, 3 }
  0x29   : > { %p421_p12 = pnand %p2014_p10, %p420_p11 }
  0x2b   : > { %424 = sbr.rel (%p421_p12) target bundleno = 1793 (0x701), region = 83 }
  0x32   : > { %s2639_s28 = sand.u32 1, %s2500_s22   ;;  %s2017_s29 = sshll.u32 %s2602_s25, 2 }
  0x33   : > { %3032 = sst [smem:[#allocation16_spill]] %s2639_s28  ;;  %s2015_s15 = sshll.u32 %s2639_s28, 5 }
  0x34   : > { %s2016_s16 = sshll.u32 %s2639_s28, 2  ;;  %p483_p13 = scmp.lt.s32.totalorder %s2017_s29, 7 }
  0x35   : > { %s2645_s17 = sshll.u32 %s2602_s25, 6  ;;  %s2666_s13 = scalar_lea.vmem [#allocation4], %s2015_s15 }
  0x36   : > { %p494_p0 = scmp.lt.s32.totalorder %s2645_s17, 127  ;;  %s3043_s29 = smov (!%p483_p13, %s2017_s29), 7 }
  0x37   : > { %s485_s26 = scalar_lea.vmem %s2997_s0, %s3043_s29  ;;  %s2019_s3 = sshll.u32 %s3043_s29, 1 }
  0x38   : > { %s495_s18 = scalar_select %p494_p0, %s2645_s17, 127 }
  0x39   : > { %s2659_s22 = scalar_lea.vmem %s2998_s1, %s2019_s3  ;;  %s2668_s28 = scalar_lea.vmem [#allocation5], %s2016_s16 }
  0x3a   : > { %s2021_s27 = sshll.u32 %s495_s18, 2  ;;  %p2022_p1 = scmp.ne.s32.totalorder %s2602_s25, 0 }
  0x3b   : > { %s2664_s21 = scalar_lea.vmem %s2999_s2, %s2021_s27  ;;  %v2399_v4 = vld [vmem:[%s3002_s5] sm:$0xff] (!%p2022_p1)   ;;  %v2510_v5 = vmov (!%p2022_p1), 0.0   ;;  %v2400_v6 = vld [vmem:[%s3002_s5 + $0x8] sm:$0xff] (!%p2022_p1)   ;;  %vm2511_vm0 = vmmov (!%p2022_p1), 0   ;;  %vm529_vm1 = vcmask (!%p2022_p1), 261120   ;;  %vm575_vm2 = vcmask (!%p2022_p1), 523264  }
  0x3c   : > { %505 = sbr.rel (%p2022_p1) target bundleno = 285 (0x11d), region = 91  ;;  %2243 = vmatprep.subr.bf16.mxu0 (!%p2022_p1), %v2510_v5  ;;  %2247 = vmatprep.mubr.msk.bf16.mxu0 (!%p2022_p1), %vm2511_vm0, %v2510_v5  ;;  %v2401_v7 = vld [vmem:[%s3001_s4] sm:$0xff] (!%p2022_p1)   ;;  %577 = vst.msk [vmem:[#allocation3] sm:$0xff] (!%p2022_p1), %vm575_vm2, %v2510_v5  ;;  %578 = vst.msk [vmem:[#allocation3 + $0x8] sm:$0xff] (!%p2022_p1), %vm575_vm2, %v2510_v5 }
  0x3d   : > { %2244 = vmatpush3.bf16.msra.mxu0 (!%p2022_p1), %v2399_v4  ;;  %579 = vst.msk [vmem:[#allocation3 + $0x10] sm:$0xff] (!%p2022_p1), %vm575_vm2, %v2510_v5  ;;  %580 = vst.msk [vmem:[#allocation3 + $0x18] sm:$0xff] (!%p2022_p1), %vm575_vm2, %v2510_v5 }
  0x3e   : > { %2245 = vmatprep.subr.bf16.mxu0 (!%p2022_p1), %v2510_v5  ;;  %581 = vst.msk [vmem:[#allocation3 + $0x20] sm:$0xff] (!%p2022_p1), %vm575_vm2, %v2510_v5  ;;  %582 = vst.msk [vmem:[#allocation3 + $0x28] sm:$0xff] (!%p2022_p1), %vm575_vm2, %v2510_v5 }
  0x41   : > { %2246 = vmatpush3.bf16.msra.mxu0 (!%p2022_p1), %v2400_v6 }
  0x44   : > { %2248 = vmatmul.mubr.msk.bf16.vlgmr.msra.gmra.mrb[0].mxu0 %vm529_vm1, %v2401_v7 }
 0x117   : > { %v567_v8 = vpop.f32.mrb[0].mxu0 }
 0x118   : > { %v2249_v9 = vpop.f32.mrb[1].mxu0 }
 0x119   : > { %v570_v10 = vpop.f32.mrb[2].mxu0 }
 0x11a   : > { %v574_v11 = vpack.c.bf16 %v570_v10, %v567_v8  ;;  %v2250_v12 = vpop.f32.mrb[3].mxu0 }
 0x11c   : > { %576 = vst.msk [vmem:[#allocation2] sm:$0xff] %vm575_vm2, %v574_v11 }
 0x11d PF: > { %vm1110_vm3 = vcmask 130048   ;;  %v2402_v14 = vld [vmem:[%s2664_s21] sm:$0xff]   ;;  %v2403_v15 = vld [vmem:[%s2664_s21 + $0x8] sm:$0xff]   ;;  %v2404_v16 = vld [vmem:[%s2664_s21 + $0x10] sm:$0xff]   ;;  %v594_v52 = vlaneseq  ;;  %vm1654_vm6 = vcmask 523264   ;;  %p2110_p2 = scmp.ne.s32.totalorder %s2602_s25, 1 }
 0x11e   : > { %2253 = vmatprep.mubr.msk.bf16.mxu0 %vm1110_vm3, %v2402_v14  ;;  %v2405_v17 = vld [vmem:[%s2664_s21 + $0x18] sm:$0xff]   ;;  %v2406_v18 = vld [vmem:[%s2664_s21 + $0x20] sm:$0xff]   ;;  %v2407_v19 = vld [vmem:[%s2664_s21 + $0x28] sm:$0xff]   ;;  %vm2513_vm7 = vmmov (!%p2110_p2), 0   ;;  %vm1691_vm8 = vcmask (!%p2110_p2), 392192   ;;  %vm1848_vm9 = vcmask (!%p2110_p2), 59392  }
 0x11f   : > { %v2408_v20 = vld [vmem:[%s2664_s21 + $0x30] sm:$0xff]   ;;  %v2418_v21 = vld [vmem:[%s2664_s21 + $0xc0] sm:$0xff]   ;;  %v2419_v22 = vld [vmem:[%s2664_s21 + $0xc8] sm:$0xff]   ;;  %v620_v54 = vshrl.u32 %v594_v52, 7  ;;  %vm596_vm5 = vcmp.lt.s32.totalorder %v594_v52, 512  ;;  %vm1874_vm10 = vcmask (!%p2110_p2), 1041408  }
 0x120   : > { %2301 = vmatprep.mubr.msk.bf16.mxu1 %vm1110_vm3, %v2418_v21  ;;  %v2422_v23 = vld [vmem:[%s2664_s21 + $0xd0] sm:$0xff]   ;;  %v2409_v24 = vld [vmem:[%s2664_s21 + $0x38] sm:$0xff]   ;;  %v2426_v26 = vld [vmem:[%s2664_s21 + $0xe0] sm:$0xff]   ;;  %vm1887_vm12 = vcmask (!%p2110_p2), 8192  }
 0x121   : > { %v2423_v25 = vld [vmem:[%s2664_s21 + $0xd8] sm:$0xff]   ;;  %v2410_v27 = vld [vmem:[%s2664_s21 + $0x40] sm:$0xff]   ;;  %v2427_v28 = vld [vmem:[%s2664_s21 + $0xe8] sm:$0xff]   ;;  %v2750_v56 = vsub.s32 0, %v620_v54  ;;  %v625_v57 = vsub.s32 1, %v620_v54 }
 0x122   : > { %v2411_v29 = vld [vmem:[%s2664_s21 + $0x48] sm:$0xff]   ;;  %v2430_v30 = vld [vmem:[%s2664_s21 + $0xf0] sm:$0xff]   ;;  %v2431_v32 = vld [vmem:[%s2664_s21 + $0xf8] sm:$0xff]  }
 0x123   : > { %v949_v13 = vld [vmem:[#allocation2] sm:$0xff]  ;;  %v2412_v31 = vld [vmem:[%s2664_s21 + $0x50] sm:$0xff]   ;;  %v2413_v33 = vld [vmem:[%s2664_s21 + $0x58] sm:$0xff]  }
 0x124   : > { %2251 = vmatprep.subr.bf16.mxu0 %v949_v13  ;;  %2353 = vmatprep.subr.bf16.mxu1 %v949_v13  ;;  %v2414_v34 = vld [vmem:[%s2664_s21 + $0x60] sm:$0xff]   ;;  %v2415_v35 = vld [vmem:[%s2664_s21 + $0x68] sm:$0xff]   ;;  %v2416_v36 = vld [vmem:[%s2664_s21 + $0x70] sm:$0xff]  }
 0x125   : > { %2252 = vmatpush3.bf16.msra.mxu0 %v949_v13  ;;  %2354 = vmatpush3.bf16.msra.mxu1 %v949_v13  ;;  %v2417_v37 = vld [vmem:[%s2664_s21 + $0x78] sm:$0xff]   ;;  %v2420_v38 = vld [vmem:[%s2664_s21 + $0x80] sm:$0xff]   ;;  %v2421_v39 = vld [vmem:[%s2664_s21 + $0x88] sm:$0xff]  }
 0x126   : > { %v2424_v40 = vld [vmem:[%s2664_s21 + $0x90] sm:$0xff]   ;;  %v2425_v41 = vld [vmem:[%s2664_s21 + $0x98] sm:$0xff]   ;;  %v2428_v42 = vld [vmem:[%s2664_s21 + $0xa0] sm:$0xff]  }
 0x127   : > { %v2429_v43 = vld [vmem:[%s2664_s21 + $0xa8] sm:$0xff]   ;;  %v2432_v44 = vld [vmem:[%s2664_s21 + $0xb0] sm:$0xff]   ;;  %v2433_v45 = vld [vmem:[%s2664_s21 + $0xb8] sm:$0xff]  }
 0x128   : > { %2254 = vmatmul.mubr.msk.bf16.vlgmr.msra.gmra.mrb[0].mxu0 %vm1110_vm3, %v2403_v15  ;;  %2302 = vmatmul.mubr.msk.bf16.vlgmr.msra.gmra.mrb[0].mxu1 %vm1110_vm3, %v2419_v22  ;;  %v583_v46 = vld [vmem:[%s485_s26] sm:$0xf]  ;;  %v600_v4 = vld [vmem:[%s2666_s13] sm:$0xff]  ;;  %v602_v5 = vld [vmem:[%s2666_s13 + $0x10] sm:$0xff] }
 0x129   : > { %2257 = vmatprep.mubr.msk.bf16.mxu0 %vm1110_vm3, %v2404_v16  ;;  %2305 = vmatprep.mubr.msk.bf16.mxu1 %vm1110_vm3, %v2422_v23  ;;  %v584_v47 = vand.u32 2147483647, %v583_v46  ;;  %vm588_vm4 = vcmp.ge.f32.partialorder %v583_v46, 0.0  ;;  %v2027_v9 = vld.sshfl [vmem:[%s2659_s22] sm:$0xff pattern:$0x75316420] }
 0x12b   : > { %v585_v48 = vsub.f32 0.0, %v584_v47 }
 0x12d   : > { %v586_v49 = vmul.f32 1.442695, %v585_v48 }
 0x12f   : > { %2434 = vpow2.f32 %v586_v49 }
 0x130   : > { %2258 = vmatmul.mubr.msk.bf16.gmra.mrb[4].mxu0 %vm1110_vm3, %v2405_v17  ;;  %2306 = vmatmul.mubr.msk.bf16.gmra.mrb[4].mxu1 %vm1110_vm3, %v2423_v25 }
 0x131   : > { %2261 = vmatprep.mubr.msk.bf16.mxu0 %vm1110_vm3, %v2406_v18  ;;  %2309 = vmatprep.mubr.msk.bf16.mxu1 %vm1110_vm3, %v2426_v26 }
 0x138   : > { %2262 = vmatmul.mubr.msk.bf16.gmra.mrb[8].mxu0 %vm1110_vm3, %v2407_v19  ;;  %2310 = vmatmul.mubr.msk.bf16.gmra.mrb[8].mxu1 %vm1110_vm3, %v2427_v28  ;;  %v615_v19 = vcombine.high %v2027_v9, %v2027_v9 }
 0x139   : > { %2265 = vmatprep.mubr.msk.bf16.mxu0 %vm1110_vm3, %v2408_v20  ;;  %2313 = vmatprep.mubr.msk.bf16.mxu1 %vm1110_vm3, %v2430_v30  ;;  %v2435_v50 = vpop.eup %2434 }
 0x13a   : > { %v589_v51 = vadd.f32 1.0, %v2435_v50 }
 0x13c   : > { %2436 = vrcp.f32 %v589_v51 }
 0x140   : > { %2266 = vmatmul.mubr.msk.bf16.gmra.mrb[12].mxu0 %vm1110_vm3, %v2409_v24  ;;  %2314 = vmatmul.mubr.msk.bf16.gmra.mrb[12].mxu1 %vm1110_vm3, %v2431_v32 }
 0x141   : > { %2269 = vmatprep.mubr.msk.bf16.mxu0 %vm1110_vm3, %v2410_v27 }
 0x146   : > { %v2437_v53 = vpop.eup %2436 }
 0x147   : > { %v592_v55 = vmul.f32 %v2437_v53, %v2435_v50 }
 0x148   : > { %2270 = vmatmul.mubr.msk.bf16.gmra.mrb[16].mxu0 %vm1110_vm3, %v2411_v29 }
 0x149   : > { %2273 = vmatprep.mubr.msk.bf16.mxu0 %vm1110_vm3, %v2412_v31  ;;  %v593_v58 = vsel %vm588_vm4, %v2437_v53, %v592_v55 }
 0x14a   : > { %v622_v59 = vrot.slane %v593_v58, %v2750_v56  ;;  %v626_v60 = vrot.slane %v593_v58, %v625_v57  ;;  %v604_v6 = vsub.f32 1.0, %v593_v58  ;;  %598 = vst.msk [vmem:[%s2668_s28] sm:$0xf] %vm596_vm5, %v593_v58 }
 0x14c   : > { %v639_v61 = vpack.c.bf16 %v622_v59, %v622_v59  ;;  %v640_v62 = vpack.c.bf16 %v626_v60, %v626_v60  ;;  %v614_v10 = vadd.f32 %v2027_v9, %v604_v6  ;;  %v617_v22 = vadd.f32 %v615_v19, %v604_v6 }
 0x14e   : > { %v644_v63 = vpack.i.b16 %v639_v61, %v639_v61  ;;  %v651_v0 = vpack.i.b16 %v640_v62, %v640_v62  ;;  %v691_v13 = vrot.slane %v614_v10, %v2750_v56  ;;  %v695_v14 = vrot.slane %v614_v10, %v625_v57 }
 0x14f   : > { %v760_v24 = vrot.slane %v617_v22, %v2750_v56  ;;  %v764_v25 = vrot.slane %v617_v22, %v625_v57 }
 0x150   : > { %2274 = vmatmul.mubr.msk.bf16.gmra.mrb[20].mxu0 %vm1110_vm3, %v2413_v33  ;;  %v649_v1 = vrot.slane %v644_v63, %v2750_v56  ;;  %v656_v2 = vrot.slane %v651_v0, %v2750_v56  ;;  %v708_v15 = vpack.c.bf16 %v691_v13, %v691_v13  ;;  %v709_v16 = vpack.c.bf16 %v695_v14, %v695_v14 }
 0x151   : > { %2277 = vmatprep.mubr.msk.bf16.mxu0 %vm1110_vm3, %v2414_v34  ;;  %v777_v28 = vpack.c.bf16 %v760_v24, %v760_v24  ;;  %v778_v29 = vpack.c.bf16 %v764_v25, %v764_v25 }
 0x152   : > { %v2028_v3 = vcombine.low %v649_v1, %v656_v2  ;;  %v713_v17 = vpack.i.b16 %v708_v15, %v708_v15  ;;  %v720_v18 = vpack.i.b16 %v709_v16, %v709_v16 }
 0x153   : > { %v782_v31 = vpack.i.b16 %v777_v28, %v777_v28  ;;  %v789_v32 = vpack.i.b16 %v778_v29, %v778_v29 }
 0x154   : > { %v2757_v7 = vmul.bf16 %v2028_v3, %v600_v4  ;;  %v2759_v8 = vmul.bf16 %v2028_v3, %v602_v5  ;;  %v718_v20 = vrot.slane %v713_v17, %v2750_v56  ;;  %v725_v21 = vrot.slane %v720_v18, %v2750_v56 }
 0x155   : > { %v787_v34 = vrot.slane %v782_v31, %v2750_v56 }
 0x156   : > { %v2035_v11 = vcombine.high %v2757_v7, %v2759_v8  ;;  %v2034_v12 = vcombine.low %v2757_v7, %v2759_v8  ;;  %v2030_v23 = vcombine.low %v718_v20, %v725_v21  ;;  %v601_v7 = vld [vmem:[%s2666_s13 + $0x8] sm:$0xff]  ;;  %v603_v8 = vld [vmem:[%s2666_s13 + $0x18] sm:$0xff] }
 0x158   : > { %2278 = vmatmul.mubr.msk.bf16.gmra.mrb[24].mxu0 %vm1110_vm3, %v2415_v35  ;;  %1566 = vmatprep.mubr.bf16.mxu1 %v2035_v11  ;;  %v2772_v26 = vmul.bf16 %v2030_v23, %v600_v4  ;;  %v2774_v27 = vmul.bf16 %v2030_v23, %v602_v5  ;;  %v794_v35 = vrot.slane %v789_v32, %v2750_v56 }
 0x159   : > { %2281 = vmatprep.mubr.msk.bf16.mxu0 %vm1110_vm3, %v2416_v36 }
 0x15a   : > { %v2039_v30 = vcombine.high %v2772_v26, %v2774_v27  ;;  %v2038_v33 = vcombine.low %v2772_v26, %v2774_v27  ;;  %v2032_v36 = vcombine.low %v787_v34, %v794_v35 }
 0x160   : > { %2282 = vmatmul.mubr.msk.bf16.gmra.mrb[28].mxu0 %vm1110_vm3, %v2417_v37  ;;  %v629_v37 = vsub.s32 2, %v620_v54 }
 0x161   : > { %2285 = vmatprep.mubr.msk.bf16.mxu0 %vm1110_vm3, %v2420_v38  ;;  %v633_v38 = vsub.s32 3, %v620_v54 }
 0x162   : > { %v699_v53 = vrot.slane %v614_v10, %v629_v37  ;;  %v768_v63 = vrot.slane %v617_v22, %v629_v37 }
 0x163   : > { %v703_v54 = vrot.slane %v614_v10, %v633_v38  ;;  %v772_v0 = vrot.slane %v617_v22, %v633_v38 }
 0x164   : > { %v710_v55 = vpack.c.bf16 %v699_v53, %v699_v53  ;;  %v779_v1 = vpack.c.bf16 %v768_v63, %v768_v63 }
 0x165   : > { %v711_v57 = vpack.c.bf16 %v703_v54, %v703_v54  ;;  %v780_v2 = vpack.c.bf16 %v772_v0, %v772_v0 }
 0x166   : > { %v796_v3 = vpack.i.b16 %v779_v1, %v779_v1 }
 0x167   : > { %v734_v59 = vpack.i.b16 %v711_v57, %v711_v57 }
 0x168   : > { %2286 = vmatmul.mubr.msk.bf16.gmra.mrb[32].mxu0 %vm1110_vm3, %v2421_v39  ;;  %v2782_v39 = vmul.bf16 %v2032_v36, %v600_v4  ;;  %v803_v4 = vpack.i.b16 %v780_v2, %v780_v2 }
 0x169   : > { %2289 = vmatprep.mubr.msk.bf16.mxu0 %vm1110_vm3, %v2424_v40  ;;  %v2784_v40 = vmul.bf16 %v2032_v36, %v602_v5  ;;  %v739_v61 = vrot.slane %v734_v59, %v2750_v56  ;;  %v801_v5 = vrot.slane %v796_v3, %v2750_v56 }
 0x16a   : > { %v808_v6 = vrot.slane %v803_v4, %v2750_v56 }
 0x16c   : > { %v2800_v9 = vcombine.low %v801_v5, %v808_v6 }
 0x170   : > { %2290 = vmatmul.mubr.msk.bf16.gmra.mrb[36].mxu0 %vm1110_vm3, %v2425_v41  ;;  %v630_v41 = vrot.slane %v593_v58, %v629_v37 }
 0x171   : > { %2293 = vmatprep.mubr.msk.bf16.mxu0 %vm1110_vm3, %v2428_v42  ;;  %v634_v42 = vrot.slane %v593_v58, %v633_v38  ;;  %v727_v58 = vpack.i.b16 %v710_v55, %v710_v55 }
 0x173   : > { %v642_v46 = vpack.c.bf16 %v634_v42, %v634_v42  ;;  %v732_v60 = vrot.slane %v727_v58, %v2750_v56 }
 0x175   : > { %v665_v48 = vpack.i.b16 %v642_v46, %v642_v46  ;;  %v2796_v62 = vcombine.low %v732_v60, %v739_v61 }
 0x177   : > { %v670_v50 = vrot.slane %v665_v48, %v2750_v56 }
 0x178   : > { %2294 = vmatmul.mubr.msk.bf16.gmra.mrb[40].mxu0 %vm1110_vm3, %v2429_v43  ;;  %v2043_v43 = vcombine.high %v2782_v39, %v2784_v40 }
 0x179   : > { %2297 = vmatprep.mubr.msk.bf16.mxu0 %vm1110_vm3, %v2432_v44  ;;  %v2042_v44 = vcombine.low %v2782_v39, %v2784_v40  ;;  %v753_v39 = vmul.bf16 %v2796_v62, %v601_v7  ;;  %v755_v40 = vmul.bf16 %v2796_v62, %v603_v8 }
 0x180   : > { %2298 = vmatmul.mubr.msk.bf16.gmra.mrb[44].mxu0 %vm1110_vm3, %v2433_v45  ;;  %v641_v45 = vpack.c.bf16 %v630_v41, %v630_v41 }
 0x182   : > { %v658_v47 = vpack.i.b16 %v641_v45, %v641_v45 }
 0x184   : > { %v663_v49 = vrot.slane %v658_v47, %v2750_v56 }
 0x186   : > { %v2792_v51 = vcombine.low %v663_v49, %v670_v50 }
 0x1fb   : > { %v2255_v10 = vpop.f32.mrb[0].mxu0  ;;  %v2808_v23 = vpop.f32.mrb[0].mxu1 }
 0x1fc   : > { %v1241_v11 = vpop.f32.mrb[1].mxu0  ;;  %v2812_v24 = vpop.f32.mrb[1].mxu1 }
 0x1fd   : > { %v2256_v13 = vpop.f32.mrb[2].mxu0  ;;  %v2814_v28 = vpop.f32.mrb[2].mxu1 }
 0x1fe   : > { %v1497_v14 = vpack.c.bf16 %v2256_v13, %v2255_v10  ;;  %v1244_v15 = vpop.f32.mrb[3].mxu0  ;;  %v1521_v31 = vpack.c.bf16 %v2814_v28, %v2808_v23  ;;  %v2820_v32 = vpop.f32.mrb[3].mxu1 }
 0x1ff   : > { %v1496_v16 = vpack.c.bf16 %v1244_v15, %v1241_v11  ;;  %v1520_v36 = vpack.c.bf16 %v2820_v32, %v2812_v24 }
 0x203   : > { %v2802_v17 = vpop.f32.mrb[4].mxu0  ;;  %v2826_v38 = vpop.f32.mrb[4].mxu1 }
 0x204   : > { %v1257_v18 = vpop.f32.mrb[5].mxu0  ;;  %v2830_v42 = vpop.f32.mrb[5].mxu1 }
 0x205   : > { %v2804_v19 = vpop.f32.mrb[6].mxu0  ;;  %v2832_v46 = vpop.f32.mrb[6].mxu1 }
 0x206   : > { %v1499_v20 = vpack.c.bf16 %v2804_v19, %v2802_v17  ;;  %v1260_v21 = vpop.f32.mrb[7].mxu0  ;;  %v1523_v48 = vpack.c.bf16 %v2832_v46, %v2826_v38  ;;  %v2838_v49 = vpop.f32.mrb[7].mxu1 }
 0x207   : > { %v1498_v22 = vpack.c.bf16 %v1260_v21, %v1257_v18  ;;  %v1522_v54 = vpack.c.bf16 %v2838_v49, %v2830_v42  ;;  %v822_v49 = vmul.bf16 %v2800_v9, %v601_v7 }
 0x20b   : > { %v2810_v56 = vpop.f32.mrb[8].mxu0  ;;  %v2844_v57 = vpop.f32.mrb[8].mxu1 }
 0x20c   : > { %v1273_v25 = vpop.f32.mrb[9].mxu0  ;;  %v2846_v59 = vpop.f32.mrb[9].mxu1 }
 0x20d   : > { %v2816_v29 = vpop.f32.mrb[10].mxu0  ;;  %v2848_v61 = vpop.f32.mrb[10].mxu1 }
 0x20e   : > { %v1501_v34 = vpack.c.bf16 %v2816_v29, %v2810_v56  ;;  %v1276_v35 = vpop.f32.mrb[11].mxu0  ;;  %v1525_v0 = vpack.c.bf16 %v2848_v61, %v2844_v57  ;;  %v2852_v1 = vpop.f32.mrb[11].mxu1  ;;  %v2040_v57 = vcombine.low %v753_v39, %v755_v40 }
 0x20f   : > { %v1500_v37 = vpack.c.bf16 %v1276_v35, %v1273_v25  ;;  %v1524_v4 = vpack.c.bf16 %v2852_v1, %v2846_v59 }
 0x213   : > { %v2828_v41 = vpop.f32.mrb[12].mxu0  ;;  %v2856_v6 = vpop.f32.mrb[12].mxu1 }
 0x214   : > { %v1289_v45 = vpop.f32.mrb[13].mxu0  ;;  %v2858_v11 = vpop.f32.mrb[13].mxu1 }
 0x215   : > { %v2834_v47 = vpop.f32.mrb[14].mxu0  ;;  %v2860_v15 = vpop.f32.mrb[14].mxu1 }
 0x216   : > { %v1503_v50 = vpack.c.bf16 %v2834_v47, %v2828_v41  ;;  %v1292_v53 = vpop.f32.mrb[15].mxu0  ;;  %v1527_v18 = vpack.c.bf16 %v2860_v15, %v2856_v6  ;;  %v2864_v19 = vpop.f32.mrb[15].mxu1 }
 0x217   : > { %v1502_v55 = vpack.c.bf16 %v1292_v53, %v1289_v45 }
 0x21b   : > { %v2271_v58 = vpop.f32.mrb[16].mxu0 }
 0x21c   : > { %v1305_v60 = vpop.f32.mrb[17].mxu0 }
 0x21d   : > { %v2272_v63 = vpop.f32.mrb[18].mxu0 }
 0x21e   : > { %v1505_v2 = vpack.c.bf16 %v2272_v63, %v2271_v58  ;;  %v1308_v3 = vpop.f32.mrb[19].mxu0 }
 0x21f   : > { %v1504_v5 = vpack.c.bf16 %v1308_v3, %v1305_v60 }
 0x221   : > { %2163 = vmatprep.subr.bf16.mxu1 %v1504_v5 }
 0x222   : > { %2164 = vmatpush3.bf16.msra.mxu1 %v1496_v16  ;;  %v1526_v16 = vpack.c.bf16 %v2864_v19, %v2858_v11 }
 0x223   : > { %v2275_v10 = vpop.f32.mrb[20].mxu0  ;;  %2165 = vmatprep.subr.bf16.mxu1 %v1505_v2 }
 0x224   : > { %v1321_v13 = vpop.f32.mrb[21].mxu0 }
 0x225   : > { %v2276_v17 = vpop.f32.mrb[22].mxu0 }
 0x226   : > { %v1507_v21 = vpack.c.bf16 %v2276_v17, %v2275_v10  ;;  %v1324_v56 = vpop.f32.mrb[23].mxu0  ;;  %2166 = vmatpush3.bf16.msra.mxu1 %v1497_v14 }
 0x227   : > { %v1506_v25 = vpack.c.bf16 %v1324_v56, %v1321_v13 }
 0x229   : > { %2167 = vmatprep.subr.bf16.mxu1 %v1506_v25 }
 0x22a   : > { %2168 = vmatpush3.bf16.msra.mxu1 %v1498_v22 }
 0x22b   : > { %v2279_v29 = vpop.f32.mrb[24].mxu0  ;;  %2169 = vmatprep.subr.bf16.mxu1 %v1507_v21 }
 0x22c   : > { %v1337_v35 = vpop.f32.mrb[25].mxu0 }
 0x22d   : > { %v2280_v41 = vpop.f32.mrb[26].mxu0 }
 0x22e   : > { %v1509_v45 = vpack.c.bf16 %v2280_v41, %v2279_v29  ;;  %v1340_v47 = vpop.f32.mrb[27].mxu0  ;;  %2170 = vmatpush3.bf16.msra.mxu1 %v1499_v20 }
 0x22f   : > { %v1508_v53 = vpack.c.bf16 %v1340_v47, %v1337_v35 }
 0x231   : > { %2171 = vmatprep.subr.bf16.mxu1 %v1508_v53 }
 0x232   : > { %2172 = vmatpush3.bf16.msra.mxu1 %v1500_v37 }
 0x233   : > { %v2283_v58 = vpop.f32.mrb[28].mxu0  ;;  %2173 = vmatprep.subr.bf16.mxu1 %v1509_v45 }
 0x234   : > { %v1353_v60 = vpop.f32.mrb[29].mxu0 }
 0x235   : > { %v2284_v14 = vpop.f32.mrb[30].mxu0 }
 0x236   : > { %v1511_v63 = vpack.c.bf16 %v2284_v14, %v2283_v58  ;;  %v1356_v2 = vpop.f32.mrb[31].mxu0  ;;  %2174 = vmatpush3.bf16.msra.mxu1 %v1501_v34 }
 0x237   : > { %v1510_v3 = vpack.c.bf16 %v1356_v2, %v1353_v60 }
 0x239   : > { %2175 = vmatprep.subr.bf16.mxu1 %v1510_v3 }
 0x23a   : > { %2176 = vmatpush3.bf16.msra.mxu1 %v1502_v55 }
 0x23b   : > { %v2287_v22 = vpop.f32.mrb[32].mxu0  ;;  %2177 = vmatprep.subr.bf16.mxu1 %v1511_v63  ;;  %v1528_v63 = vld [vmem:[#allocation3] sm:$0xff] }
 0x23c   : > { %v1369_v5 = vpop.f32.mrb[33].mxu0 }
 0x23d   : > { %v2288_v10 = vpop.f32.mrb[34].mxu0 }
 0x23e   : > { %v1513_v13 = vpack.c.bf16 %v2288_v10, %v2287_v22  ;;  %v1372_v17 = vpop.f32.mrb[35].mxu0  ;;  %2178 = vmatpush3.bf16.msra.mxu1 %v1503_v50 }
 0x23f   : > { %v1512_v20 = vpack.c.bf16 %v1372_v17, %v1369_v5  ;;  %2197 = vmatprep.subr.bf16.mxu1 %v1520_v36  ;;  %v1529_v5 = vld [vmem:[#allocation3 + $0x8] sm:$0xff] }
 0x241   : > { %1567 = vmatmul.mubr.bf16.vlgmr.msra.gmra.mrb[16].mxu1 %v2034_v12  ;;  %v684_v12 = vmul.bf16 %v2792_v51, %v601_v7 }
 0x242   : > { %2198 = vmatpush3.bf16.msra.mxu1 %v1512_v20  ;;  %1574 = vmatprep.mubr.bf16.mxu1 %v2039_v30  ;;  %v686_v30 = vmul.bf16 %v2792_v51, %v603_v8 }
 0x243   : > { %v2291_v34 = vpop.f32.mrb[36].mxu0  ;;  %2199 = vmatprep.subr.bf16.mxu1 %v1521_v31 }
 0x244   : > { %v1385_v37 = vpop.f32.mrb[37].mxu0  ;;  %v2037_v26 = vcombine.high %v684_v12, %v686_v30 }
 0x245   : > { %v2292_v50 = vpop.f32.mrb[38].mxu0 }
 0x246   : > { %v1515_v55 = vpack.c.bf16 %v2292_v50, %v2291_v34  ;;  %v1388_v21 = vpop.f32.mrb[39].mxu0  ;;  %2200 = vmatpush3.bf16.msra.mxu1 %v1513_v13 }
 0x247   : > { %v1514_v24 = vpack.c.bf16 %v1388_v21, %v1385_v37  ;;  %2201 = vmatprep.subr.bf16.mxu1 %v1522_v54  ;;  %v824_v54 = vmul.bf16 %v2800_v9, %v603_v8  ;;  %v1531_v8 = vld [vmem:[#allocation3 + $0x18] sm:$0xff] }
 0x249   : > { %1575 = vmatmul.mubr.bf16.gmra.mrb[20].mxu1 %v2038_v33  ;;  %v2045_v59 = vcombine.high %v822_v49, %v824_v54  ;;  %v2044_v61 = vcombine.low %v822_v49, %v824_v54 }
 0x24a   : > { %2202 = vmatpush3.bf16.msra.mxu1 %v1514_v24  ;;  %1582 = vmatprep.mubr.bf16.mxu1 %v2043_v43 }
 0x24b   : > { %v2295_v23 = vpop.f32.mrb[40].mxu0  ;;  %2203 = vmatprep.subr.bf16.mxu1 %v1523_v48  ;;  %v2041_v48 = vcombine.high %v753_v39, %v755_v40 }
 0x24c   : > { %v1401_v28 = vpop.f32.mrb[41].mxu0 }
 0x24d   : > { %v2296_v31 = vpop.f32.mrb[42].mxu0 }
 0x24e   : > { %v1517_v32 = vpack.c.bf16 %v2296_v31, %v2295_v23  ;;  %v1404_v36 = vpop.f32.mrb[43].mxu0  ;;  %2204 = vmatpush3.bf16.msra.mxu1 %v1515_v55  ;;  %v1530_v55 = vld [vmem:[#allocation3 + $0x10] sm:$0xff] }
 0x24f   : > { %v1516_v27 = vpack.c.bf16 %v1404_v36, %v1401_v28  ;;  %2205 = vmatprep.subr.bf16.mxu1 %v1524_v4 }
 0x251   : > { %1583 = vmatmul.mubr.bf16.gmra.mrb[24].mxu1 %v2042_v44  ;;  %v2036_v44 = vcombine.low %v684_v12, %v686_v30 }
 0x252   : > { %2206 = vmatpush3.bf16.msra.mxu1 %v1516_v27  ;;  %1623 = vmatprep.mubr.bf16.mxu1 %v2037_v26  ;;  %v1532_v26 = vld [vmem:[#allocation3 + $0x20] sm:$0xff] }
 0x253   : > { %v2299_v33 = vpop.f32.mrb[44].mxu0  ;;  %2207 = vmatprep.subr.bf16.mxu1 %v1525_v0 }
 0x254   : > { %v1417_v43 = vpop.f32.mrb[45].mxu0 }
 0x255   : > { %v2300_v51 = vpop.f32.mrb[46].mxu0 }
 0x256   : > { %v1519_v38 = vpack.c.bf16 %v2300_v51, %v2299_v33  ;;  %v1420_v42 = vpop.f32.mrb[47].mxu0  ;;  %2208 = vmatpush3.bf16.msra.mxu1 %v1517_v32  ;;  %v1533_v51 = vld [vmem:[#allocation3 + $0x28] sm:$0xff] }
 0x257   : > { %v1518_v46 = vpack.c.bf16 %v1420_v42, %v1417_v43  ;;  %2209 = vmatprep.subr.bf16.mxu1 %v1526_v16 }
 0x25a   : > { %2210 = vmatpush3.bf16.msra.mxu1 %v1518_v46 }
 0x25b   : > { %2211 = vmatprep.subr.bf16.mxu1 %v1527_v18 }
 0x25e   : > { %2212 = vmatpush3.bf16.msra.mxu1 %v1519_v38 }
 0x261   : > { %1624 = vmatmul.mubr.bf16.vlgmr.msra.gmra.mrb[28].mxu1 %v2036_v44  ;;  %v2111_v44 = vld [vmem:[%s3003_s6] ss:$0 sm:$0xff] (!%p2110_p2) }
 0x262   : > { %1631 = vmatprep.mubr.bf16.mxu1 %v2041_v48  ;;  %v2512_v48 = vmov (!%p2110_p2), 0.0|0.0  }
 0x263   : > { %2344 = vmatprep.subr.bf16.mxu0 (!%p2110_p2), %v2512_v48 }
 0x269   : > { %1632 = vmatmul.mubr.bf16.gmra.mrb[32].mxu1 %v2040_v57 }
 0x26a   : > { %1639 = vmatprep.mubr.bf16.mxu1 %v2045_v59 }
 0x271   : > { %1640 = vmatmul.mubr.bf16.gmra.mrb[36].mxu1 %v2044_v61 }
 0x314   : > { %v2179_v62 = vpop.f32.mrb[16].mxu1 }
 0x315   : > { %v2180_v0 = vpop.f32.mrb[17].mxu1 }
 0x316   : > { %v2181_v1 = vadd.f32 %v2180_v0, %v2179_v62  ;;  %v2182_v4 = vpop.f32.mrb[18].mxu1 }
 0x317   : > { %v2183_v6 = vpop.f32.mrb[19].mxu1 }
 0x318   : > { %v2184_v11 = vadd.f32 %v2183_v6, %v2182_v4  ;;  %v2514_v4 = vmov (!%p2110_p2), 0.0  }
 0x319   : > { %2329 = vmatprep.mubr.msk.f32.mxu0 (!%p2110_p2), %vm2513_vm7, %v2514_v4  ;;  %2332 = vmatprep.subr.bf16.mxu1 (!%p2110_p2), %v2514_v4 }
 0x31a   : > { %2340 = vmatprep.mubr.msk.bf16.mxu1 (!%p2110_p2), %vm2513_vm7, %v2514_v4 }
 0x31c   : > { %v2185_v15 = vpop.f32.mrb[20].mxu1 }
 0x31d   : > { %v2186_v18 = vpop.f32.mrb[21].mxu1 }
 0x31e   : > { %v2187_v19 = vadd.f32 %v2186_v18, %v2185_v15  ;;  %v2188_v56 = vpop.f32.mrb[22].mxu1 }
 0x31f   : > { %v2189_v16 = vpop.f32.mrb[23].mxu1 }
 0x320   : > { %v2190_v25 = vadd.f32 %v2189_v16, %v2188_v56 }
 0x324   : > { %v2191_v29 = vpop.f32.mrb[24].mxu1 }
 0x325   : > { %v2192_v9 = vpop.f32.mrb[25].mxu1 }
 0x326   : > { %v2193_v35 = vadd.f32 %v2192_v9, %v2191_v29  ;;  %v2194_v41 = vpop.f32.mrb[26].mxu1  ;;  %v2439_v29 = vld [vmem:[%s3004_s7 + $0x8] sm:$0xff] (!%p2110_p2)  }
 0x327   : > { %v2195_v45 = vpop.f32.mrb[27].mxu1 }
 0x328   : > { %v2196_v47 = vadd.f32 %v2195_v45, %v2194_v41  ;;  %v2440_v45 = vld [vmem:[%s3004_s7 + $0x10] sm:$0xff] (!%p2110_p2)  }
 0x334   : > { %v2213_v53 = vpop.f32.mrb[28].mxu1 }
 0x335   : > { %v2214_v58 = vpop.f32.mrb[29].mxu1 }
 0x336   : > { %v2215_v60 = vadd.f32 %v2214_v58, %v2213_v53  ;;  %v2216_v14 = vpop.f32.mrb[30].mxu1  ;;  %v1690_v53 = vld [vmem:[%s3006_s9] sm:$0x7] (!%p2110_p2)  ;;  %v2441_v58 = vld [vmem:[%s3004_s7 + $0x18] sm:$0xff] (!%p2110_p2)  }
 0x337   : > { %v2217_v2 = vpop.f32.mrb[31].mxu1 }
 0x338   : > { %v1626_v3 = vadd.f32 %v2215_v60, %v2181_v1  ;;  %v2218_v22 = vadd.f32 %v2217_v2, %v2216_v14  ;;  %v2113_v2 = vld [vmem:[%s3005_s8] ss:$0 sm:$0xff] (!%p2110_p2) }
 0x33a   : > { %v1648_v10 = vadd.f32 %v1626_v3, %v1528_v63  ;;  %v1629_v13 = vadd.f32 %v2218_v22, %v2184_v11 }
 0x33c   : > { %1655 = vst.msk [vmem:[#allocation3] sm:$0xff] %vm1654_vm6, %v1648_v10  ;;  %v1649_v17 = vadd.f32 %v1629_v13, %v1529_v5  ;;  %v2219_v20 = vpop.f32.mrb[32].mxu1 }
 0x33d   : > { %v2220_v34 = vpop.f32.mrb[33].mxu1 }
 0x33e   : > { %1656 = vst.msk [vmem:[#allocation3 + $0x8] sm:$0xff] %vm1654_vm6, %v1649_v17  ;;  %v2221_v37 = vadd.f32 %v2220_v34, %v2219_v20  ;;  %v2222_v50 = vpop.f32.mrb[34].mxu1 }
 0x33f   : > { %v2223_v21 = vpop.f32.mrb[35].mxu1 }
 0x340   : > { %v1634_v24 = vadd.f32 %v2221_v37, %v2187_v19  ;;  %v2224_v7 = vadd.f32 %v2223_v21, %v2222_v50  ;;  %v2438_v19 = vld [vmem:[%s3004_s7] sm:$0xff] (!%p2110_p2)  }
 0x341   : > { %2333 = vmatpush3.bf16.msra.mxu1 (!%p2110_p2), %v2438_v19 }
 0x342   : > { %v1650_v12 = vadd.f32 %v1634_v24, %v1530_v55  ;;  %v1637_v30 = vadd.f32 %v2224_v7, %v2190_v25  ;;  %2334 = vmatprep.subr.bf16.mxu1 (!%p2110_p2), %v2514_v4  ;;  %v2119_v7 = vld [vmem:[%s3007_s10] ss:$0 sm:$0xff] (!%p2110_p2) }
 0x343   : > { %v1665_v39 = vld [vmem:[#allocation3] sm:$0xff] (!%p2110_p2) }
 0x344   : > { %1657 = vst.msk [vmem:[#allocation3 + $0x10] sm:$0xff] %vm1654_vm6, %v1650_v12  ;;  %v1651_v23 = vadd.f32 %v1637_v30, %v1531_v8  ;;  %v2225_v28 = vpop.f32.mrb[36].mxu1  ;;  %v1678_v49 = vadd.f32 (!%p2110_p2), %v2111_v44, %v1665_v39 }
 0x345   : > { %v2226_v31 = vpop.f32.mrb[37].mxu1  ;;  %v1666_v40 = vld [vmem:[#allocation3 + $0x8] sm:$0xff] (!%p2110_p2)  ;;  %2335 = vmatpush3.bf16.msra.mxu1 (!%p2110_p2), %v2439_v29 }
 0x346   : > { %1658 = vst.msk [vmem:[#allocation3 + $0x18] sm:$0xff] %vm1654_vm6, %v1651_v23  ;;  %v2227_v32 = vadd.f32 %v2226_v31, %v2225_v28  ;;  %v2228_v36 = vpop.f32.mrb[38].mxu1  ;;  %v1679_v54 = vadd.f32 (!%p2110_p2), %v2111_v44, %v1666_v40  ;;  %v1684_v6 = vmax.f32 (!%p2110_p2), %v1678_v49, 0.0  ;;  %2336 = vmatprep.subr.bf16.mxu1 (!%p2110_p2), %v2514_v4 }
 0x347   : > { %v2229_v27 = vpop.f32.mrb[39].mxu1 }
 0x348   : > { %v1642_v33 = vadd.f32 %v2227_v32, %v2193_v35  ;;  %v2230_v43 = vadd.f32 %v2229_v27, %v2228_v36  ;;  %1664 = sbr.rel (%p2110_p2) target bundleno = 1769 (0x6e9), region = 95  ;;  %v1685_v11 = vmax.f32 (!%p2110_p2), %v1679_v54, 0.0 }
 0x349   : > { %2337 = vmatpush3.bf16.msra.mxu1 (!%p2110_p2), %v2440_v45 }
 0x34a   : > { %v1652_v38 = vadd.f32 %v1642_v33, %v1532_v26  ;;  %v1645_v42 = vadd.f32 %v2230_v43, %v2196_v47  ;;  %v2345_v25 = vpack.c.bf16 (!%p2110_p2), %v1685_v11, %v1684_v6  ;;  %2338 = vmatprep.subr.bf16.mxu1 (!%p2110_p2), %v2514_v4  ;;  %v1884_v33 = vand.u32 (!%p2110_p2), 127, %v594_v52 }
 0x34b   : > { %v1667_v57 = vld [vmem:[#allocation3 + $0x10] sm:$0xff] (!%p2110_p2) }
 0x34c   : > { %1659 = vst.msk [vmem:[#allocation3 + $0x20] sm:$0xff] %vm1654_vm6, %v1652_v38  ;;  %v1653_v46 = vadd.f32 %v1645_v42, %v1533_v51  ;;  %v1680_v62 = vadd.f32 (!%p2110_p2), %v2111_v44, %v1667_v57  ;;  %2346 = vmatpush3.bf16.msra.mxu0 (!%p2110_p2), %v2345_v25  ;;  %vm1885_vm11 = vcmp.eq.s32.totalorder (!%p2110_p2), %v1884_v33, 0 }
 0x34d   : > { %v1668_v59 = vld [vmem:[#allocation3 + $0x18] sm:$0xff] (!%p2110_p2)  ;;  %2347 = vmatprep.subr.bf16.mxu0 (!%p2110_p2), %v2512_v48  ;;  %2339 = vmatpush3.bf16.msra.mxu1 (!%p2110_p2), %v2441_v58 }
 0x34e   : > { %1660 = vst.msk [vmem:[#allocation3 + $0x28] sm:$0xff] %vm1654_vm6, %v1653_v46  ;;  %v1681_v0 = vadd.f32 (!%p2110_p2), %v2111_v44, %v1668_v59  ;;  %v1686_v56 = vmax.f32 (!%p2110_p2), %v1680_v62, 0.0 }
 0x350   : > { %v1687_v16 = vmax.f32 %v1681_v0, 0.0 }
 0x352   : > { %v2348_v9 = vpack.c.bf16 %v1687_v16, %v1686_v56 }
 0x353   : > { %v1669_v61 = vld [vmem:[#allocation3 + $0x20] sm:$0xff] }
 0x354   : > { %v1682_v15 = vadd.f32 %v2111_v44, %v1669_v61  ;;  %2349 = vmatpush3.bf16.msra.mxu0 %v2348_v9 }
 0x355   : > { %v1670_v1 = vld [vmem:[#allocation3 + $0x28] sm:$0xff]  ;;  %2350 = vmatprep.subr.bf16.mxu0 %v2512_v48 }
 0x356   : > { %v1683_v18 = vadd.f32 %v2111_v44, %v1670_v1  ;;  %v1688_v35 = vmax.f32 %v1682_v15, 0.0 }
 0x358   : > { %v1689_v41 = vmax.f32 %v1683_v18, 0.0 }
 0x35a   : > { %v2351_v47 = vpack.c.bf16 %v1689_v41, %v1688_v35 }
 0x35c   : > { %2352 = vmatpush3.bf16.msra.mxu0 %v2351_v47 }
 0x35f   : > { %2330 = vmatmul.mubr.msk.f32.vlgmr.msra.gmra.mrb[0].mxu0 %vm1691_vm8, %v1690_v53 }
 0x432   : > { %v1761_v60 = vpop.f32.mrb[0].mxu0 }
 0x433   : > { %v1765_v14 = vpack.c.bf16 %v1761_v60, %v1761_v60  ;;  %v2331_v63 = vpop.f32.mrb[1].mxu0 }
 0x435   : > { %2341 = vmatmul.mubr.msk.bf16.vlgmr.msra.gmra.mrb[0].mxu1 %vm1654_vm6, %v1765_v14 }
 0x508   : > { %v1842_v3 = vpop.f32.mrb[0].mxu1 }
 0x509   : > { %v1843_v22 = vadd.f32 %v2113_v2, %v1842_v3  ;;  %v2342_v5 = vpop.f32.mrb[1].mxu1 }
 0x50a   : > { %v1845_v10 = vpop.f32.mrb[2].mxu1 }
 0x50b   : > { %v2343_v13 = vpop.f32.mrb[3].mxu1  ;;  %v1849_v17 = vsel %vm1848_vm9, %v1843_v22, -inf }
 0x50c   : > { %1850 = vmax.xlane.f32.xlu0 %v1849_v17 }
 0x599   : > { %v1851_v20 = vpop.xlane.xlu0 %1850 }
 0x59a   : > { %v1852_v34 = vsub.f32 %v1843_v22, %v1851_v20 }
 0x59c   : > { %v1853_v37 = vmul.f32 1.442695, %v1852_v34 }
 0x59e   : > { %2442 = vpow2.f32 %v1853_v37 }
 0x5a8   : > { %v2443_v50 = vpop.eup %2442 }
 0x5a9   : > { %v1855_v55 = vsel %vm1848_vm9, %v2443_v50, 0.0 }
 0x5aa   : > { %1856 = vadd.xlane.f32.xlu0 %v1855_v55 }
 0x637   : > { %v1857_v21 = vpop.xlane.xlu0 %1856 }
 0x638   : > { %2444 = vrcp.f32 %v1857_v21 }
 0x642   : > { %v2445_v24 = vpop.eup %2444 }
 0x643   : > { %v1859_v8 = vmul.f32 %v2445_v24, %v2443_v50 }
 0x645   : > { %v1867_v12 = vmul.f32 %v2119_v7, %v1859_v8 }
 0x647   : > { %v1868_v30 = vsel %vm1848_vm9, %v1867_v12, 0.0 }
 0x648   : > { %1869 = vadd.xlane.f32.xlu1 %v1868_v30 }
 0x6d5   : > { %v1870_v23 = vpop.xlane.xlu1 %1869 }
 0x6d6   : > { %v1872_v28 = vrot.slane %v1870_v23, 1 }
 0x6d8   : > { %v1875_v31 = vsel %vm1874_vm10, %v1872_v28, 0.0 }
 0x6d9   : > { %v1876_v32 = vrot.slane %v1875_v31, 4 }
 0x6db   : > { %v1877_v36 = vadd.f32 %v1876_v32, %v1875_v31 }
 0x6dd   : > { %v1878_v26 = vrot.slane %v1877_v36, 2 }
 0x6df   : > { %v1879_v27 = vadd.f32 %v1878_v26, %v1877_v36 }
 0x6e1   : > { %v1880_v43 = vrot.slane %v1879_v27, 1 }
 0x6e3   : > { %v1881_v51 = vadd.f32 %v1880_v43, %v1879_v27 }
 0x6e5   : > { %v1882_v38 = vmul.f32 0.5, %v1881_v51 }
 0x6e7   : > { %v1886_v42 = vsel %vm1885_vm11, %v1870_v23, %v1882_v38 }
 0x6e8   : > { %1888 = vst.msk [vmem:[%s3008_s11] sm:$0x1] %vm1887_vm12, %v1886_v42 }
 0x6e9 PF: > { %s3033_s13 = sld [smem:[#allocation16_spill]]  ;;  %s2958_s15 = scalar_lea.hbm %s3009_s12, %s2645_s17 }
 0x6ea   : > { %s1907_s16 = sshll.u32 %s2668_s28, 4  ;;  %s2515_s19 = smov [#allocation5]   ;;  %s1908_s16 = int_to_ptr.vmem [resolvable:$true] %s1907_s16 }
 0x6eb   : > { %s2446_s26 = scalar_lea.vmem %s1908_s16, 64  ;;  %s2450_s20 = sshll.u32 %s2515_s19, 4  ;;  %s2451_s20 = int_to_ptr.vmem [resolvable:$false] %s2450_s20 }
 0x6ec   : > { %p2447_p3 = scmp.ne.s32.totalorder %s1908_s16, %s2446_s26  ;;  %s2452_s3 = scalar_lea.vmem %s2451_s20, 128 }
 0x6ed   : > { %p2453_p7 = scmp.lt.s32.totalorder %s1908_s16, %s2451_s20  ;;  %p2454_p10 = scmp.lt.s32.totalorder %s2452_s3, %s2446_s26 }
 0x6ee   : > { %p2448_p4 = pnand %p2447_p3, %p2620_p6 }
 0x6ef   : > { %s1890_s18 = scalar_lea.sflag [#allocation6], %s3033_s13  ;;  %p2455_p11 = por %p2454_p10, %p2453_p7 }
 0x6f0   : > { %p2449_p5 = pneg %p2448_p4 }
 0x6f2   : > { %p2456_p12 = pnand %p2455_p11, %p2449_p5 }
 0x6f4   : > { %2459 = shalt.err (!%p2456_p12)
}
 0x6f5   : > { %s2460_s28 = scalar_lea.hbm %s2958_s15, 64  ;;  %s2464_s24 = scalar_lea.hbm %s3009_s12, 128 }
 0x6f6   : > { %p2461_p13 = scmp.ne.s32.totalorder %s2958_s15, %s2460_s28  ;;  %p2465_p2 = scmp.lt.u32.totalorder %s2958_s15, %s3009_s12 }
 0x6f7   : > { %p2466_p3 = scmp.lt.u32.totalorder %s2464_s24, %s2460_s28  ;;  %p2468_p5 = scmp.lt.u32.totalorder %s2460_s28, %s2958_s15 }
 0x6f8   : > { %p2462_p0 = pnand %p2461_p13, %p2620_p6 }
 0x6f9   : > { %p2467_p4 = por %p2466_p3, %p2465_p2 }
 0x6fa   : > { %p2463_p1 = pneg %p2462_p0 }
 0x6fb   : > { %p2469_p7 = por %p2468_p5, %p2467_p4 }
 0x6fd   : > { %p2470_p10 = pnand %p2469_p7, %p2463_p1 }
 0x6ff   : > { %2473 = shalt.err (!%p2470_p10)
}
 0x700   : > { %2355 = dma.vmem_to_hbm [thread:$0]  (%p2620_p6), %s1908_s16, 64, %s2958_s15, %s1890_s18  }
 0x701 PF: > { %s3035_s14 = sld [smem:[#allocation8_spill]]  ;;  %p2358_p11 = pnand %p2010_p9, %p2624_p8 }
 0x707   : > { %s1922_s25 = sand.u32 1, %s3035_s14  }
 0x708   : > { %s1923_s13 = scalar_lea.sflag [#allocation6], %s1922_s25 }
 0x709   : > { %2491 = dma.done.wait (!%p2358_p11), %s1923_s13, 64  }
 0x70a   : > { %2493 = vsyncadd (!%p2358_p11), %s1923_s13, 4294967232  ;;  %s3038_s24 = sld [smem:[#allocation12_spill]]  ;;  %s3039_s21 = sld [smem:[#allocation9_spill]] }
 0x70b   : > { %s3040_s22 = sld [smem:[#allocation10_spill]]  ;;  %s3041_s23 = sld [smem:[#allocation13_spill]] }
 0x710   : > { %p23_p12 = scmp.ge.s32.totalorder %s3038_s24, 4  }
 0x712   :  { %25 = sbr.rel (!%p23_p12) target bundleno = 5 (0x5), region = 152 }
 0x719   :  { %1928 = vsyncpa [#allocation6], 1 }
 0x71a   :  { %1930 = vsyncpa [#allocation6 + $0x1], 1 }

</bundles_post_ra>
